<compile_context>
chip_gen: v7x
topology: tpu7x:2x2x1
jax: 0.10.0
libtpu: 0.0.40
codegen_flags: <defaults>
</compile_context>

<pallas_src>
import functools

import jax
import jax.numpy as jnp
from jax import lax
from jax.experimental import pallas as pl
from jax.experimental.pallas import tpu as pltpu

IGNORE_INDEX = -100


def _ce_partial_kernel(logits_ref, tgt_ref, psum_ref, pcnt_ref, *, num_rows, ignore_index):
    """Per-tile masked cross-entropy partial sums.

    logits_ref: (TM, C) tile of logits (native dtype; cast to f32 in-register)
    tgt_ref:    (TM, 1) i32 tile of targets
    psum_ref:   (1, 1, 128) f32 partial loss sum for this tile (broadcast across lanes)
    pcnt_ref:   (1, 1, 128) f32 partial valid-row count for this tile
    """
    i = pl.program_id(0)
    tm = logits_ref.shape[0]

    x = logits_ref[...].astype(jnp.float32)        # (TM, C)
    t = tgt_ref[...]                               # (TM, 1) int32

    # Numerically-stable log-sum-exp per row.
    m = jnp.max(x, axis=-1, keepdims=True)                                    # (TM, 1)
    lse = jnp.log(jnp.sum(jnp.exp(x - m), axis=-1, keepdims=True)) + m        # (TM, 1)

    # Gather logit at the target class via iota+mask (no dynamic gather on TPU).
    # NOTE: out-of-range targets (>= C, or negative != ignore_index) silently
    # contribute tgt_logit = 0 instead of raising like PyTorch.
    col = lax.broadcasted_iota(jnp.int32, x.shape, 1)                         # (TM, C)
    tgt_logit = jnp.sum(jnp.where(col == t, x, 0.0), axis=-1, keepdims=True)  # (TM, 1)

    # Validity mask: real rows (the last tile may hang past num_rows -> the read
    # window is padded with garbage which we mask out here) AND not ignore_index.
    row = lax.broadcasted_iota(jnp.int32, (tm, 1), 0) + i * tm                # (TM, 1)
    valid = (row < num_rows) & (t != ignore_index)                            # (TM, 1)

    per_row = jnp.where(valid, lse - tgt_logit, 0.0)
    cnt = jnp.where(valid, 1.0, 0.0)

    # One sublane reduce per tile; write lane-dense partials (no cross-step carry,
    # so the grid axis stays 'parallel').
    psum_ref[...] = jnp.full((1, 1, 128), jnp.sum(per_row), dtype=jnp.float32)
    pcnt_ref[...] = jnp.full((1, 1, 128), jnp.sum(cnt), dtype=jnp.float32)


def _pick_vmem_limit_bytes():
    """Generation-aware scoped-VMEM request (v7x only has 64 MiB physical)."""
    try:
        cap = int(pltpu.get_tpu_info().vmem_capacity_bytes)
    except Exception:
        cap = 64 << 20  # conservative fallback (safe on v5e/v6e/v7x)
    return min(cap * 3 // 4, 96 << 20)


def _pick_tile_m(M, C, itemsize, vmem_limit_bytes):
    """Largest row tile (multiple of 8, <=1024) whose double-buffered logits fit."""
    budget = vmem_limit_bytes // 2          # headroom for target tiles / outputs / misc
    tm = budget // (2 * C * max(1, itemsize))  # 2x for double buffering
    tm = min(1024, tm)
    tm = min(tm, ((M + 7) // 8) * 8)        # don't tile past the (padded) row count
    tm = max(8, (tm // 8) * 8)
    return int(tm)


def _cross_entropy_pallas(logits, targets, *, ignore_index=IGNORE_INDEX, tile_m=None):
    """logits: [M, C] (any float dtype), targets: [M] int -> scalar mean CE loss."""
    M, C = logits.shape
    targets2d = targets.astype(jnp.int32).reshape(M, 1)

    vmem_limit_bytes = _pick_vmem_limit_bytes()
    if tile_m is None:
        tile_m = _pick_tile_m(M, C, jnp.dtype(logits.dtype).itemsize, vmem_limit_bytes)

    num_tiles = pl.cdiv(M, tile_m)

    kernel = functools.partial(
        _ce_partial_kernel, num_rows=M, ignore_index=ignore_index
    )

    psum, pcnt = pl.pallas_call(
        kernel,
        out_shape=(
            jax.ShapeDtypeStruct((num_tiles, 1, 128), jnp.float32),
            jax.ShapeDtypeStruct((num_tiles, 1, 128), jnp.float32),
        ),
        grid_spec=pltpu.PrefetchScalarGridSpec(
            num_scalar_prefetch=0,
            grid=(num_tiles,),
            in_specs=[
                pl.BlockSpec((tile_m, C), lambda i: (i, 0)),  # full class axis per tile
                pl.BlockSpec((tile_m, 1), lambda i: (i, 0)),
            ],
            out_specs=[
                pl.BlockSpec((1, 1, 128), lambda i: (i, 0, 0)),
                pl.BlockSpec((1, 1, 128), lambda i: (i, 0, 0)),
            ],
        ),
        compiler_params=pltpu.CompilerParams(
            dimension_semantics=("parallel",),      # independent per-tile partials
            vmem_limit_bytes=int(vmem_limit_bytes),
        ),
    )(logits, targets2d)

    total = jnp.sum(psum[:, 0, 0])
    count = jnp.sum(pcnt[:, 0, 0])
    # If every target equals ignore_index this is 0/0 = nan (matches PyTorch).
    return total / count


def spin_attention_loss(predicts, batch, *, ignore_index=IGNORE_INDEX):
    """JAX/Pallas equivalent of SPINAttentionLoss.forward.

    predicts: [N, num_steps, num_classes] float (native dtype streamed into the kernel)
    batch:    tuple/list; batch[1] is labels [N, num_steps + 1] int
    """
    targets = batch[1].astype(jnp.int32)
    targets = targets[:, 1:]                                  # drop leading token
    assert targets.ndim == predicts.ndim - 1, (
        "The target's shape and inputs's shape is [N, d] and [N, num_steps]"
    )
    num_classes = predicts.shape[-1]
    inputs = predicts.reshape(-1, num_classes)
    targets = targets.reshape(-1)
    loss = _cross_entropy_pallas(inputs, targets, ignore_index=ignore_index)
    return {"loss": loss}


def _reference_loss(predicts, labels, ignore_index=IGNORE_INDEX):
    """Pure-JAX reference for a sanity check."""
    targets = labels.astype(jnp.int32)[:, 1:].reshape(-1)
    logits = predicts.reshape(-1, predicts.shape[-1]).astype(jnp.float32)
    lse = jax.nn.logsumexp(logits, axis=-1)
    tgt_safe = jnp.where(targets == ignore_index, 0, targets)
    tgt_logit = jnp.take_along_axis(logits, tgt_safe[:, None], axis=-1)[:, 0]
    valid = targets != ignore_index
    per_row = jnp.where(valid, lse - tgt_logit, 0.0)
    return jnp.sum(per_row) / jnp.sum(valid.astype(jnp.float32))


if __name__ == "__main__":
    key = jax.random.PRNGKey(0)

    # --- Test 1: shapes from the module spec (single tile, auto tile_m) ---
    N, num_steps, num_classes = 2, 8, 32
    k1, k2, k3, k4 = jax.random.split(key, 4)
    predicts = jax.random.normal(k1, (N, num_steps, num_classes), dtype=jnp.float32)
    labels = jax.random.randint(k2, (N, num_steps + 1), 0, num_classes, dtype=jnp.int32)
    labels = labels.at[0, 5].set(IGNORE_INDEX)
    labels = labels.at[1, 8].set(IGNORE_INDEX)

    out = spin_attention_loss(predicts, (None, labels))
    loss = jax.block_until_ready(out["loss"])
    ref = _reference_loss(predicts, labels)
    assert jnp.allclose(loss, ref, rtol=1e-5, atol=1e-5), (loss, ref)

    # --- Test 2: multi-tile path + partial last tile (forces tile_m=8, M=21 rows) ---
    N2, steps2, C2 = 3, 7, 40
    predicts2 = jax.random.normal(k3, (N2, steps2, C2), dtype=jnp.float32)
    labels2 = jax.random.randint(k4, (N2, steps2 + 1), 0, C2, dtype=jnp.int32)
    labels2 = labels2.at[2, 3].set(IGNORE_INDEX)
    loss2 = _cross_entropy_pallas(
        predicts2.reshape(-1, C2), labels2[:, 1:].reshape(-1), tile_m=8
    )
    loss2 = jax.block_until_ready(loss2)
    ref2 = _reference_loss(predicts2, labels2)
    assert jnp.allclose(loss2, ref2, rtol=1e-5, atol=1e-5), (loss2, ref2)

    print("KERNEL_OK")
</pallas_src>

<mosaic_0001>
module attributes {stable_mosaic.version = 11 : i64} {
  func.func @_ce_partial_kernel(%arg0: i32, %arg1: memref<16x32xf32, #tpu.memory_space<vmem>>, %arg2: memref<16x1xi32, #tpu.memory_space<vmem>>, %arg3: memref<1x1x128xf32, #tpu.memory_space<vmem>>, %arg4: memref<1x1x128xf32, #tpu.memory_space<vmem>>) attributes {dimension_semantics = [#tpu.dimension_semantics<parallel>], iteration_bounds = array<i64: 1>, scalar_prefetch = 0 : i64, scratch_operands = 0 : i64, tpu.core_type = #tpu.core_type<tc>, window_params = [{transform_indices = @transform_0, window_bounds = array<i64: 16, 32>}, {transform_indices = @transform_1, window_bounds = array<i64: 16, 1>}, {transform_indices = @transform_2, window_bounds = array<i64: 1, 1, 128>}, {transform_indices = @transform_3, window_bounds = array<i64: 1, 1, 128>}]} {
    %c0 = arith.constant 0 : index
    %c0_0 = arith.constant 0 : index
    %0 = vector.load %arg1[%c0, %c0_0] : memref<16x32xf32, #tpu.memory_space<vmem>>, vector<16x32xf32>
    %c0_1 = arith.constant 0 : index
    %c0_2 = arith.constant 0 : index
    %1 = vector.load %arg2[%c0_1, %c0_2] : memref<16x1xi32, #tpu.memory_space<vmem>>, vector<16x1xi32>
    %cst = arith.constant dense<0xFF800000> : vector<16xf32>
    %2 = vector.multi_reduction <maximumf>, %0, %cst [1] : vector<16x32xf32> to vector<16xf32>
    %3 = vector.shape_cast %2 : vector<16xf32> to vector<16x1xf32>
    %4 = vector.broadcast %3 : vector<16x1xf32> to vector<16x32xf32>
    %5 = arith.subf %0, %4 : vector<16x32xf32>
    %6 = math.exp %5 : vector<16x32xf32>
    %cst_3 = arith.constant dense<0.000000e+00> : vector<16xf32>
    %7 = vector.multi_reduction <add>, %6, %cst_3 [1] : vector<16x32xf32> to vector<16xf32>
    %8 = vector.shape_cast %7 : vector<16xf32> to vector<16x1xf32>
    %9 = math.log %8 : vector<16x1xf32>
    %10 = arith.addf %9, %3 : vector<16x1xf32>
    %11 = tpu.iota {dimensions = array<i32: 1>} : vector<16x32xi32>
    %12 = vector.broadcast %1 : vector<16x1xi32> to vector<16x32xi32>
    %13 = arith.cmpi eq, %11, %12 : vector<16x32xi32>
    %cst_4 = arith.constant 0.000000e+00 : f32
    %14 = vector.broadcast %cst_4 : f32 to vector<16x32xf32>
    %15 = arith.select %13, %0, %14 : vector<16x32xi1>, vector<16x32xf32>
    %cst_5 = arith.constant dense<0.000000e+00> : vector<16xf32>
    %16 = vector.multi_reduction <add>, %15, %cst_5 [1] : vector<16x32xf32> to vector<16xf32>
    %17 = vector.shape_cast %16 : vector<16xf32> to vector<16x1xf32>
    %18 = tpu.iota {dimensions = array<i32: 0>} : vector<16x1xi32>
    %c16_i32 = arith.constant 16 : i32
    %19 = arith.muli %arg0, %c16_i32 : i32
    %20 = vector.broadcast %19 : i32 to vector<16x1xi32>
    %21 = arith.addi %18, %20 : vector<16x1xi32>
    %c16_i32_6 = arith.constant 16 : i32
    %22 = vector.broadcast %c16_i32_6 : i32 to vector<16x1xi32>
    %23 = arith.cmpi slt, %21, %22 : vector<16x1xi32>
    %c-100_i32 = arith.constant -100 : i32
    %24 = vector.broadcast %c-100_i32 : i32 to vector<16x1xi32>
    %25 = arith.cmpi ne, %1, %24 : vector<16x1xi32>
    %26 = arith.andi %23, %25 : vector<16x1xi1>
    %27 = arith.subf %10, %17 : vector<16x1xf32>
    %cst_7 = arith.constant 0.000000e+00 : f32
    %28 = vector.broadcast %cst_7 : f32 to vector<16x1xf32>
    %29 = arith.select %26, %27, %28 : vector<16x1xi1>, vector<16x1xf32>
    %cst_8 = arith.constant 1.000000e+00 : f32
    %cst_9 = arith.constant 0.000000e+00 : f32
    %30 = vector.broadcast %cst_8 : f32 to vector<16x1xf32>
    %31 = vector.broadcast %cst_9 : f32 to vector<16x1xf32>
    %32 = arith.select %26, %30, %31 : vector<16x1xi1>, vector<16x1xf32>
    %33 = vector.shape_cast %29 : vector<16x1xf32> to vector<1x16x1xf32>
    %cst_10 = arith.constant dense<0.000000e+00> : vector<1xf32>
    %34 = vector.multi_reduction <add>, %33, %cst_10 [1, 2] : vector<1x16x1xf32> to vector<1xf32>
    %35 = vector.shape_cast %34 : vector<1xf32> to vector<1x1x1xf32>
    %36 = vector.extract %35[0, 0, 0] : f32 from vector<1x1x1xf32>
    %37 = vector.broadcast %36 : f32 to vector<1x1x128xf32>
    %c0_11 = arith.constant 0 : index
    %c0_12 = arith.constant 0 : index
    %c0_13 = arith.constant 0 : index
    %38 = vector.load %arg3[%c0_11, %c0_12, %c0_13] : memref<1x1x128xf32, #tpu.memory_space<vmem>>, vector<1x1x128xf32>
    tpu.vector_store %arg3[%c0_11, %c0_12, %c0_13], %37 {strides = array<i32>} : memref<1x1x128xf32, #tpu.memory_space<vmem>>, vector<1x1x128xf32>,
    %39 = vector.shape_cast %32 : vector<16x1xf32> to vector<1x16x1xf32>
    %cst_14 = arith.constant dense<0.000000e+00> : vector<1xf32>
    %40 = vector.multi_reduction <add>, %39, %cst_14 [1, 2] : vector<1x16x1xf32> to vector<1xf32>
    %41 = vector.shape_cast %40 : vector<1xf32> to vector<1x1x1xf32>
    %42 = vector.extract %41[0, 0, 0] : f32 from vector<1x1x1xf32>
    %43 = vector.broadcast %42 : f32 to vector<1x1x128xf32>
    %c0_15 = arith.constant 0 : index
    %c0_16 = arith.constant 0 : index
    %c0_17 = arith.constant 0 : index
    %44 = vector.load %arg4[%c0_15, %c0_16, %c0_17] : memref<1x1x128xf32, #tpu.memory_space<vmem>>, vector<1x1x128xf32>
    tpu.vector_store %arg4[%c0_15, %c0_16, %c0_17], %43 {strides = array<i32>} : memref<1x1x128xf32, #tpu.memory_space<vmem>>, vector<1x1x128xf32>,
    return
  }
  func.func @transform_0(%arg0: i32) -> (i32, i32) {
    %c0_i32 = arith.constant 0 : i32
    %c0_i32_0 = arith.constant 0 : i32
    return %arg0, %c0_i32 : i32, i32
  }
  func.func @transform_1(%arg0: i32) -> (i32, i32) {
    %c0_i32 = arith.constant 0 : i32
    %c0_i32_0 = arith.constant 0 : i32
    return %arg0, %c0_i32 : i32, i32
  }
  func.func @transform_2(%arg0: i32) -> (i32, i32, i32) {
    %c0_i32 = arith.constant 0 : i32
    %c0_i32_0 = arith.constant 0 : i32
    %c0_i32_1 = arith.constant 0 : i32
    return %arg0, %c0_i32, %c0_i32_0 : i32, i32, i32
  }
  func.func @transform_3(%arg0: i32) -> (i32, i32, i32) {
    %c0_i32 = arith.constant 0 : i32
    %c0_i32_0 = arith.constant 0 : i32
    %c0_i32_1 = arith.constant 0 : i32
    return %arg0, %c0_i32, %c0_i32_0 : i32, i32, i32
  }
}

</mosaic_0001>

<bundles_post_ra>
// kernel: tpu_custom_call.1
= control target key start
LH: loop header
LB: loop body
LE: loop exit
PB: predicated region body
PF: predicated region fallthrough
CT: control target
= control target key end

     0   :  { %9 = vsyncpa [#allocation3], 0  ;;  %vm19_vm0 = vcmask 261120   ;;  %v204_v4 = vmov 0   ;;  %s278_s0 = inlined_call_operand.vmem [shape: f32[16,32], index: 0, kind: input, shape index: {}]   ;;  %s279_s1 = inlined_call_operand.vmem [shape: s32[16,1], index: 1, kind: input, shape index: {}]   ;;  %s280_s2 = inlined_call_operand.hbm [shape: f32[1,1,128], index: 2, kind: output, shape index: {0}]   ;;  %s281_s3 = inlined_call_operand.hbm [shape: f32[1,1,128], index: 3, kind: output, shape index: {1}]  }
   0x1   :  { %v15_v0 = vld [vmem:[%s278_s0] sm:$0xff]  ;;  %v16_v1 = vld [vmem:[%s278_s0 + $0x8] sm:$0xff]  ;;  %146 = vset.pattern.permute.xlu1 %v204_v4  ;;  %147 = vset.pattern.permute.xlu0 %v204_v4 }
   0x2   :  { %v17_v2 = vld [vmem:[%s279_s1] sm:$0xff]  ;;  %v20_v3 = vsel %vm19_vm0, %v15_v0, -inf }
   0x3   :  { %10 = vsyncpa [#allocation5], 0  ;;  %21 = vmax.xlane.f32.xlu0 %v20_v3  ;;  %47 = vperm.xlu1 %146, %v17_v2   ;;  %v23_v5 = vsel %vm19_vm0, %v16_v1, -inf  ;;  %v18_v6 = vld [vmem:[%s279_s1 + $0x8] sm:$0xff]  ;;  %v44_v11 = vlaneseq  ;;  %vm71_vm3 = vcmp.ne.s32.totalorder %v17_v2, 4294967196  ;;  %v205_v25 = vmov 0.0  }
   0x4   :  { %v79_v26 = vsel %vm71_vm3, 1.0, %v205_v25  ;;  %vm72_vm4 = vcmp.ne.s32.totalorder %v18_v6, 4294967196  ;;  %vm81_vm5 = vcmask 7168   ;;  %s206_s0 = smov [#allocation2]   ;;  %s207_s21 = smov [#allocation4]  }
   0x5   :  { %v45_v15 = vand.u32 127, %v44_v11  ;;  %v80_v27 = vsel %vm72_vm4, 1.0, %v205_v25  ;;  %v96_v28 = vsel %vm81_vm5, %v79_v26, 0.0  ;;  %s116_s1 = sshll.u32 %s206_s0, 4  ;;  %s126_s22 = sshll.u32 %s207_s21, 4  ;;  %s117_s1 = int_to_ptr.vmem [resolvable:$true] %s116_s1  ;;  %s127_s22 = int_to_ptr.vmem [resolvable:$true] %s126_s22 }
   0x6   :  { %v97_v29 = vsel %vm81_vm5, %v80_v27, 0.0  ;;  %s156_s23 = scalar_lea.vmem %s117_s1, 16  ;;  %s160_s24 = scalar_lea.vmem %s117_s1, 32 }
   0x7   :  { %24 = vmax.xlane.f32.xlu0 %v23_v5  ;;  %50 = vperm.xlu1 %146, %v18_v6   ;;  %v98_v30 = vadd.f32 %v97_v29, %v96_v28  ;;  %p157_p0 = scmp.ne.s32.totalorder %s117_s1, %s156_s23  ;;  %p161_p1 = scmp.lt.s32.totalorder %s117_s1, %s117_s1 }
   0x8   :  { %p162_p2 = scmp.lt.s32.totalorder %s160_s24, %s156_s23 }
   0xa   :  { %p163_p3 = por %p162_p2, %p161_p1 }
   0xc   :  { %p164_p4 = pnand %p163_p3, %p157_p0 }
  0x82   :  { %v48_v14 = vpop.permute.xlu1 %47 }
  0x83   :  { %vm52_vm1 = vcmp.eq.s32.totalorder %v45_v15, %v48_v14 }
  0x84   :  { %v54_v18 = vsel %vm52_vm1, %v15_v0, 0.0 }
  0x85   :  { %v56_v20 = vsel %vm19_vm0, %v54_v18, 0.0 }
  0x86   :  { %v51_v16 = vpop.permute.xlu1 %50 }
  0x87   :  { %vm53_vm2 = vcmp.eq.s32.totalorder %v45_v15, %v51_v16 }
  0x88   :  { %v55_v22 = vsel %vm53_vm2, %v16_v1, 0.0 }
  0x89   :  { %v59_v24 = vsel %vm19_vm0, %v55_v22, 0.0 }
  0x90   :  { %v22_v7 = vpop.xlane.xlu0 %21 }
  0x91   :  { %v26_v8 = vsub.f32 %v15_v0, %v22_v7 }
  0x93   :  { %v28_v9 = vmul.f32 1.442695, %v26_v8 }
  0x94   :  { %v25_v10 = vpop.xlane.xlu0 %24 }
  0x95   :  { %148 = vpow2.f32 %v28_v9  ;;  %v27_v12 = vsub.f32 %v16_v1, %v25_v10 }
  0x97   :  { %v30_v13 = vmul.f32 1.442695, %v27_v12 }
  0x99   :  { %150 = vpow2.f32 %v30_v13 }
  0x9f   :  { %v149_v17 = vpop.eup %148 }
  0xa0   :  { %v32_v19 = vsel %vm19_vm0, %v149_v17, 0.0 }
  0xa1   :  { %33 = vadd.xlane.f32.xlu0 %v32_v19 }
  0xa3   :  { %v151_v21 = vpop.eup %150 }
  0xa4   :  { %v35_v23 = vsel %vm19_vm0, %v151_v21, 0.0 }
  0xa5   :  { %36 = vadd.xlane.f32.xlu1 %v35_v23  ;;  %57 = vadd.xlane.f32.xlu0 %v56_v20 }
  0xa9   :  { %60 = vadd.xlane.f32.xlu0 %v59_v24 }
 0x12e   :  { %v34_v31 = vpop.xlane.xlu0 %33 }
 0x12f   :  { %152 = vlog2.f32 %v34_v31 }
 0x132   :  { %v37_v32 = vpop.xlane.xlu1 %36  ;;  %v58_v35 = vpop.xlane.xlu0 %57 }
 0x133   :  { %154 = vlog2.f32 %v37_v32 }
 0x136   :  { %v61_v41 = vpop.xlane.xlu0 %60 }
 0x139   :  { %v153_v33 = vpop.eup %152 }
 0x13a   :  { %v39_v34 = vmul.f32 0.6931472, %v153_v33 }
 0x13c   :  { %v42_v36 = vadd.f32 %v39_v34, %v22_v7 }
 0x13d   :  { %v155_v37 = vpop.eup %154 }
 0x13e   :  { %v41_v38 = vmul.f32 0.6931472, %v155_v37  ;;  %v75_v39 = vsub.f32 %v42_v36, %v58_v35 }
 0x140   :  { %v43_v40 = vadd.f32 %v41_v38, %v25_v10  ;;  %v77_v42 = vsel %vm71_vm3, %v75_v39, 0.0 }
 0x141   :  { %v82_v45 = vsel %vm81_vm5, %v77_v42, 0.0 }
 0x142   :  { %v76_v43 = vsub.f32 %v43_v40, %v61_v41 }
 0x144   :  { %v78_v44 = vsel %vm72_vm4, %v76_v43, 0.0 }
 0x145   :  { %v83_v46 = vsel %vm81_vm5, %v78_v44, 0.0 }
 0x146   :  { %v84_v47 = vadd.f32 %v83_v46, %v82_v45 }
 0x148   :  { %85 = vadd.xlane.f32.xlu0 %v84_v47 }
 0x14c   :  { %99 = vadd.xlane.f32.xlu0 %v98_v30 }
 0x1d5   :  { %v86_v48 = vpop.xlane.xlu0 %85 }
 0x1d6   :  { %v87_v49 = vrot.slane %v86_v48, 4 }
 0x1d8   :  { %v88_v50 = vadd.f32 %v87_v49, %v86_v48 }
 0x1d9   :  { %v100_v51 = vpop.xlane.xlu0 %99 }
 0x1da   :  { %v89_v52 = vrot.slane %v88_v50, 2  ;;  %v101_v53 = vrot.slane %v100_v51, 4 }
 0x1dc   :  { %v102_v54 = vadd.f32 %v101_v53, %v100_v51  ;;  %v90_v55 = vadd.f32 %v89_v52, %v88_v50 }
 0x1de   :  { %v103_v56 = vrot.slane %v102_v54, 2  ;;  %v91_v57 = vrot.slane %v90_v55, 1 }
 0x1e0   :  { %v104_v58 = vadd.f32 %v103_v56, %v102_v54  ;;  %v92_v59 = vadd.f32 %v91_v57, %v90_v55 }
 0x1e2   :  { %138 = vpush %v92_v59  ;;  %v105_v60 = vrot.slane %v104_v58, 1 }
 0x1e4   :  { %v106_v61 = vadd.f32 %v105_v60, %v104_v58 }
 0x1e6   :  { %140 = vpush %v106_v61 }
 0x213   :  { %s139_s20 = spop %138 }
 0x214   :  { %v94_v62 = vstv %s139_s20 }
 0x215   :  { %95 = vst [vmem:[#allocation2] sm:$0x1] %v94_v62 }
 0x216   :  { %167 = shalt.err (!%p164_p4)
}
 0x217   :  { %s168_s27 = scalar_lea.hbm %s280_s2, 16 }
 0x218   :  { %p169_p5 = scmp.ne.s32.totalorder %s280_s2, %s168_s27  ;;  %p172_p6 = scmp.lt.u32.totalorder %s168_s27, %s280_s2 }
 0x21a   :  { %p174_p7 = pnand %p172_p6, %p169_p5 }
 0x21c   :  { %177 = shalt.err (!%p174_p7)
}
 0x21d   :  { %119 = dma.vmem_to_hbm [thread:$0]  %s117_s1, 16, %s280_s2, [#allocation3]  }
 0x21e   :  { %s141_s7 = spop %140  ;;  %s178_s8 = scalar_lea.vmem %s127_s22, 16 }
 0x21f   :  { %v108_v63 = vstv %s141_s7  ;;  %p179_p8 = scmp.ne.s32.totalorder %s127_s22, %s178_s8  ;;  %s182_s9 = scalar_lea.vmem %s127_s22, 32 }
 0x220   :  { %109 = vst [vmem:[#allocation4] sm:$0x1] %v108_v63  ;;  %p183_p9 = scmp.lt.s32.totalorder %s127_s22, %s127_s22  ;;  %p184_p10 = scmp.lt.s32.totalorder %s182_s9, %s178_s8 }
 0x222   :  { %p185_p11 = por %p184_p10, %p183_p9 }
 0x224   :  { %p186_p12 = pnand %p185_p11, %p179_p8 }
 0x226   :  { %189 = shalt.err (!%p186_p12)
}
 0x227   :  { %s190_s12 = scalar_lea.hbm %s281_s3, 16 }
 0x228   :  { %p191_p13 = scmp.ne.s32.totalorder %s281_s3, %s190_s12  ;;  %p194_p0 = scmp.lt.u32.totalorder %s190_s12, %s281_s3 }
 0x22a   :  { %p196_p1 = pnand %p194_p0, %p191_p13 }
 0x22c   :  { %199 = shalt.err (!%p196_p1)
}
 0x22d   :  { %129 = dma.vmem_to_hbm [thread:$0]  %s127_s22, 16, %s281_s3, [#allocation5]  }
 0x22e   :  { %200 = dma.done.wait [#allocation3], 16  }
 0x22f   :  { %201 = vsyncadd [#allocation3], 4294967280 }
 0x230   :  { %202 = dma.done.wait [#allocation5], 16  }
 0x231   :  { %203 = vsyncadd [#allocation5], 4294967280 }
 0x232   :  { %136 = vsyncpa [#allocation3], 1 }
 0x233   :  { %137 = vsyncpa [#allocation5], 1 }

</bundles_post_ra>
